<compile_context>
chip_gen: v6e
topology: v6e:2x2x1
jax: 0.10.0
libtpu: 0.0.40
codegen_flags: <defaults>
</compile_context>

<pallas_src>
import jax
import jax.numpy as jnp
from jax.experimental import pallas as pl
from jax.experimental.pallas import tpu as pltpu


def _round_up(x, m):
    return (x + m - 1) // m * m


def _mlp_kernel(x_ref, w1_ref, b1_ref, w2_ref, b2_ref, w3_ref, b3_ref, o_ref):
    # Layer 1 (f32; K = nfeat is tiny): (TB, nfeat) @ (nfeat, H1P), +b, ReLU.
    h1 = jnp.dot(x_ref[...], w1_ref[...], preferred_element_type=jnp.float32)
    h1 = jnp.maximum(h1 + b1_ref[...], 0.0)

    # Layer 2: bf16 operands, f32 accumulation.  Padded rows/cols of w2 are
    # exactly zero and only 10 of the 128 output columns are meaningful, so
    # bf16 inputs with f32 accumulation are numerically safe.
    h2 = jnp.dot(h1.astype(jnp.bfloat16), w2_ref[...],
                 preferred_element_type=jnp.float32)
    h2 = jnp.maximum(h2 + b2_ref[...], 0.0)

    # Layer 3 on the VPU/XLU: logits[t] = sum_k h2[t, k] * w3[k] + b3.
    # (padded lanes of h2 and w3 are exactly zero, so the sum is exact)
    logits = jnp.sum(h2 * w3_ref[...], axis=-1, keepdims=True) + b3_ref[...]

    # Narrow (TB, 1) store: masked 1-lane stores are cheap given the huge
    # compute slack, and this keeps the HBM write stream at 4 bytes/row.
    o_ref[...] = jax.nn.sigmoid(logits)


def _prepare_kernel_params(params, nfeat):
    """Zero-pad to lane-aligned widths; store the layer-2 weight as bf16."""
    w1, b1, w2, b2, w3, b3 = params
    h1, h2 = 10 * nfeat, 10
    h1p, h2p = _round_up(h1, 128), _round_up(h2, 128)

    w1p = jnp.zeros((nfeat, h1p), jnp.float32).at[:, :h1].set(w1)
    b1p = jnp.zeros((1, h1p), jnp.float32).at[:, :h1].set(b1)
    w2p = jnp.zeros((h1p, h2p), jnp.float32).at[:h1, :h2].set(w2)
    w2p = w2p.astype(jnp.bfloat16)          # bf16 layer-2 operand (f32 acc)
    b2p = jnp.zeros((1, h2p), jnp.float32).at[:, :h2].set(b2)
    w3p = jnp.zeros((1, h2p), jnp.float32).at[:, :h2].set(w3.reshape(1, h2))
    b3p = b3.reshape(1, 1).astype(jnp.float32)
    return w1p, b1p, w2p, b2p, w3p, b3p, h1p, h2p


def _choose_tb(b, tb_req, nfeat, h1p, h2p):
    """Pick the batch-tile size.

    Per-step VMEM footprint (double-buffered f32 x tile + double-buffered
    (tb, 1) output + f32/bf16 intermediates) is ~2 MiB at tb=1024 / nfeat=16,
    nowhere near any generation's VMEM; the cap below is only a loose sanity
    bound for very wide inputs.
    """
    def step_bytes(t):
        return t * (nfeat * 4 * 2 + 4 * 2 + h1p * 4 + h1p * 2 + h2p * 4)

    tb = max(16, tb_req)
    # Keep >= 4 grid steps when the batch allows it (>= 2 per TensorCore on
    # v7x with the "parallel" grid axis), so each core retains pipeline depth
    # to overlap the x DMA / output writeback with compute.
    while tb > 128 and b < 4 * tb:
        tb //= 2
    while tb > 128 and step_bytes(tb) > (16 << 20):
        tb //= 2
    if b <= tb:
        # Small batch: single grid step, rounded to 16-row sublane granularity.
        tb = max(16, _round_up(b, 16))
    return tb


def mlp_forward(x, params, *, tb=1024):
    """x: (B, ...) -- flattened to (B, nfeat) like x.view(batch_size, -1)."""
    b = x.shape[0]
    x2d = x.reshape(b, -1).astype(jnp.float32)
    nfeat = x2d.shape[1]

    w1p, b1p, w2p, b2p, w3p, b3p, h1p, h2p = _prepare_kernel_params(params, nfeat)

    tb = _choose_tb(b, tb, nfeat, h1p, h2p)
    b_pad = _round_up(b, tb)
    grid = (b_pad // tb,)

    if b_pad != b:
        # Pad only when needed; otherwise x is streamed straight from HBM with
        # no wrapper-side copy/cast pass.
        x_in = jnp.zeros((b_pad, nfeat), jnp.float32).at[:b].set(x2d)
    else:
        x_in = x2d

    param_bytes = (w1p.size * 4 + b1p.size * 4 + w2p.size * 2
                   + b2p.size * 4 + w3p.size * 4 + b3p.size * 4)
    cost = pl.CostEstimate(
        flops=int(2 * b_pad * (nfeat * h1p + h1p * h2p + h2p)),
        transcendentals=int(b_pad),
        bytes_accessed=int(b_pad * nfeat * 4 + b_pad * 4 + param_bytes),
    )

    # Weights/biases: constant block index -> DMAed once, resident in VMEM.
    const = lambda shape: pl.BlockSpec(shape, lambda i: (0, 0))

    out = pl.pallas_call(
        _mlp_kernel,
        out_shape=jax.ShapeDtypeStruct((b_pad, 1), jnp.float32),
        grid=grid,
        in_specs=[
            pl.BlockSpec((tb, nfeat), lambda i: (i, 0)),  # streamed f32 x tile
            const(w1p.shape), const(b1p.shape),
            const(w2p.shape), const(b2p.shape),
            const(w3p.shape), const(b3p.shape),
        ],
        out_specs=pl.BlockSpec((tb, 1), lambda i: (i, 0)),
        compiler_params=pltpu.CompilerParams(
            dimension_semantics=("parallel",),  # shard batch across TCs
        ),
        cost_estimate=cost,
    )(x_in, w1p, b1p, w2p, b2p, w3p, b3p)

    return out if b_pad == b else out[:b]


def init_params(key, nfeat):
    """nn.Linear-shaped params (uniform +/- 1/sqrt(fan_in)).

    Weights are stored as (in_features, out_features) -- transposed vs torch.
    Biases are stored as (1, out_features).
    """
    dims = [(nfeat, nfeat * 10), (nfeat * 10, 10), (10, 1)]
    params = []
    for i, (fin, fout) in enumerate(dims):
        kw, kb = jax.random.split(jax.random.fold_in(key, i))
        bound = 1.0 / float(fin) ** 0.5
        w = jax.random.uniform(kw, (fin, fout), jnp.float32, -bound, bound)
        bvec = jax.random.uniform(kb, (1, fout), jnp.float32, -bound, bound)
        params.extend([w, bvec])
    return tuple(params)


def _reference(x, params):
    """Pure-f32 reference with PyTorch MLP semantics (eval mode)."""
    w1, b1, w2, b2, w3, b3 = params
    h = x.reshape(x.shape[0], -1).astype(jnp.float32)
    h = jnp.maximum(
        jnp.dot(h, w1, precision=jax.lax.Precision.HIGHEST) + b1, 0.0)
    h = jnp.maximum(
        jnp.dot(h, w2, precision=jax.lax.Precision.HIGHEST) + b2, 0.0)
    logits = jnp.dot(h, w3, precision=jax.lax.Precision.HIGHEST) + b3
    return jax.nn.sigmoid(logits)


if __name__ == "__main__":
    key = jax.random.PRNGKey(0)
    k_x, k_p = jax.random.split(key)

    # Input: batch=256, flattened features = 4*4 = 16  ->  nfeat = 16.
    batch, nfeat = 256, 16
    x = jax.random.normal(k_x, (batch, 4, 4), jnp.float32)
    params = init_params(k_p, nfeat)

    out = jax.block_until_ready(mlp_forward(x, params))
    ref = _reference(x, params)

    assert out.shape == (batch, 1), out.shape
    # Tolerance covers the bf16 layer-2 operand drift vs. full-f32 torch math
    # (measured/estimated drift is ~2e-4; 2e-3 leaves a 10x margin).
    assert jnp.allclose(out, ref, atol=2e-3, rtol=2e-3), (
        "mismatch vs f32 reference, max abs err = %s"
        % float(jnp.max(jnp.abs(out - ref))))

    print("KERNEL_OK")
</pallas_src>

<mosaic_0001>
module attributes {stable_mosaic.version = 11 : i64} {
  func.func @_mlp_kernel(%arg0: i32, %arg1: memref<128x16xf32, #tpu.memory_space<vmem>>, %arg2: memref<16x256xf32, #tpu.memory_space<vmem>>, %arg3: memref<1x256xf32, #tpu.memory_space<vmem>>, %arg4: memref<256x128xbf16, #tpu.memory_space<vmem>>, %arg5: memref<1x128xf32, #tpu.memory_space<vmem>>, %arg6: memref<1x128xf32, #tpu.memory_space<vmem>>, %arg7: memref<1x1xf32, #tpu.memory_space<vmem>>, %arg8: memref<128x1xf32, #tpu.memory_space<vmem>>) attributes {dimension_semantics = [#tpu.dimension_semantics<parallel>], iteration_bounds = array<i64: 2>, scalar_prefetch = 0 : i64, scratch_operands = 0 : i64, tpu.core_type = #tpu.core_type<tc>, window_params = [{transform_indices = @transform_0, window_bounds = array<i64: 128, 16>}, {pipeline_mode = #tpu.pipeline_mode<synchronous>, transform_indices = @transform_1, window_bounds = array<i64: 16, 256>}, {pipeline_mode = #tpu.pipeline_mode<synchronous>, transform_indices = @transform_2, window_bounds = array<i64: 1, 256>}, {pipeline_mode = #tpu.pipeline_mode<synchronous>, transform_indices = @transform_3, window_bounds = array<i64: 256, 128>}, {pipeline_mode = #tpu.pipeline_mode<synchronous>, transform_indices = @transform_4, window_bounds = array<i64: 1, 128>}, {pipeline_mode = #tpu.pipeline_mode<synchronous>, transform_indices = @transform_5, window_bounds = array<i64: 1, 128>}, {pipeline_mode = #tpu.pipeline_mode<synchronous>, transform_indices = @transform_6, window_bounds = array<i64: 1, 1>}, {transform_indices = @transform_7, window_bounds = array<i64: 128, 1>}]} {
    %c0 = arith.constant 0 : index
    %c0_0 = arith.constant 0 : index
    %0 = vector.load %arg1[%c0, %c0_0] : memref<128x16xf32, #tpu.memory_space<vmem>>, vector<128x16xf32>
    %c0_1 = arith.constant 0 : index
    %c0_2 = arith.constant 0 : index
    %1 = vector.load %arg2[%c0_1, %c0_2] : memref<16x256xf32, #tpu.memory_space<vmem>>, vector<16x256xf32>
    %cst = arith.constant dense<0.000000e+00> : vector<128x256xf32>
    %2 = tpu.matmul %0, %1, %cst {dimension_numbers = #tpu.dot_dimension_numbers<[1], [0], [0], [1], [0, 0, 1, 1], [], []>} : vector<128x16xf32>, vector<16x256xf32>, vector<128x256xf32> -> vector<128x256xf32>
    %c0_3 = arith.constant 0 : index
    %c0_4 = arith.constant 0 : index
    %3 = vector.load %arg3[%c0_3, %c0_4] : memref<1x256xf32, #tpu.memory_space<vmem>>, vector<1x256xf32>
    %4 = vector.broadcast %3 : vector<1x256xf32> to vector<128x256xf32>
    %5 = arith.addf %2, %4 : vector<128x256xf32>
    %cst_5 = arith.constant 0.000000e+00 : f32
    %6 = vector.broadcast %cst_5 : f32 to vector<128x256xf32>
    %7 = arith.maximumf %5, %6 : vector<128x256xf32>
    %8 = arith.truncf %7 : vector<128x256xf32> to vector<128x256xbf16>
    %c0_6 = arith.constant 0 : index
    %c0_7 = arith.constant 0 : index
    %9 = vector.load %arg4[%c0_6, %c0_7] : memref<256x128xbf16, #tpu.memory_space<vmem>>, vector<256x128xbf16>
    %cst_8 = arith.constant dense<0.000000e+00> : vector<128x128xf32>
    %10 = tpu.matmul %8, %9, %cst_8 {dimension_numbers = #tpu.dot_dimension_numbers<[1], [0], [0], [1], [0, 0, 1, 1], [], []>} : vector<128x256xbf16>, vector<256x128xbf16>, vector<128x128xf32> -> vector<128x128xf32>
    %c0_9 = arith.constant 0 : index
    %c0_10 = arith.constant 0 : index
    %11 = vector.load %arg5[%c0_9, %c0_10] : memref<1x128xf32, #tpu.memory_space<vmem>>, vector<1x128xf32>
    %12 = vector.broadcast %11 : vector<1x128xf32> to vector<128x128xf32>
    %13 = arith.addf %10, %12 : vector<128x128xf32>
    %cst_11 = arith.constant 0.000000e+00 : f32
    %14 = vector.broadcast %cst_11 : f32 to vector<128x128xf32>
    %15 = arith.maximumf %13, %14 : vector<128x128xf32>
    %c0_12 = arith.constant 0 : index
    %c0_13 = arith.constant 0 : index
    %16 = vector.load %arg6[%c0_12, %c0_13] : memref<1x128xf32, #tpu.memory_space<vmem>>, vector<1x128xf32>
    %17 = vector.broadcast %16 : vector<1x128xf32> to vector<128x128xf32>
    %18 = arith.mulf %15, %17 : vector<128x128xf32>
    %cst_14 = arith.constant dense<0.000000e+00> : vector<128xf32>
    %19 = vector.multi_reduction <add>, %18, %cst_14 [1] : vector<128x128xf32> to vector<128xf32>
    %20 = vector.shape_cast %19 : vector<128xf32> to vector<128x1xf32>
    %c0_15 = arith.constant 0 : index
    %c0_16 = arith.constant 0 : index
    %21 = vector.load %arg7[%c0_15, %c0_16] : memref<1x1xf32, #tpu.memory_space<vmem>>, vector<1x1xf32>
    %22 = vector.broadcast %21 : vector<1x1xf32> to vector<128x1xf32>
    %23 = arith.addf %20, %22 : vector<128x1xf32>
    %24 = arith.negf %23 : vector<128x1xf32>
    %25 = math.exp %24 : vector<128x1xf32>
    %cst_17 = arith.constant 1.000000e+00 : f32
    %26 = vector.broadcast %cst_17 : f32 to vector<128x1xf32>
    %27 = arith.addf %26, %25 : vector<128x1xf32>
    %28 = arith.divf %26, %27 : vector<128x1xf32>
    %c0_18 = arith.constant 0 : index
    %c0_19 = arith.constant 0 : index
    %29 = vector.load %arg8[%c0_18, %c0_19] : memref<128x1xf32, #tpu.memory_space<vmem>>, vector<128x1xf32>
    tpu.vector_store %arg8[%c0_18, %c0_19], %28 {strides = array<i32>} : memref<128x1xf32, #tpu.memory_space<vmem>>, vector<128x1xf32>,
    return
  }
  func.func @transform_0(%arg0: i32) -> (i32, i32) {
    %c0_i32 = arith.constant 0 : i32
    %c0_i32_0 = arith.constant 0 : i32
    return %arg0, %c0_i32 : i32, i32
  }
  func.func @transform_1(%arg0: i32) -> (i32, i32) {
    %c0_i32 = arith.constant 0 : i32
    %c0_i32_0 = arith.constant 0 : i32
    %c0_i32_1 = arith.constant 0 : i32
    return %c0_i32, %c0_i32_0 : i32, i32
  }
  func.func @transform_2(%arg0: i32) -> (i32, i32) {
    %c0_i32 = arith.constant 0 : i32
    %c0_i32_0 = arith.constant 0 : i32
    %c0_i32_1 = arith.constant 0 : i32
    return %c0_i32, %c0_i32_0 : i32, i32
  }
  func.func @transform_3(%arg0: i32) -> (i32, i32) {
    %c0_i32 = arith.constant 0 : i32
    %c0_i32_0 = arith.constant 0 : i32
    %c0_i32_1 = arith.constant 0 : i32
    return %c0_i32, %c0_i32_0 : i32, i32
  }
  func.func @transform_4(%arg0: i32) -> (i32, i32) {
    %c0_i32 = arith.constant 0 : i32
    %c0_i32_0 = arith.constant 0 : i32
    %c0_i32_1 = arith.constant 0 : i32
    return %c0_i32, %c0_i32_0 : i32, i32
  }
  func.func @transform_5(%arg0: i32) -> (i32, i32) {
    %c0_i32 = arith.constant 0 : i32
    %c0_i32_0 = arith.constant 0 : i32
    %c0_i32_1 = arith.constant 0 : i32
    return %c0_i32, %c0_i32_0 : i32, i32
  }
  func.func @transform_6(%arg0: i32) -> (i32, i32) {
    %c0_i32 = arith.constant 0 : i32
    %c0_i32_0 = arith.constant 0 : i32
    %c0_i32_1 = arith.constant 0 : i32
    return %c0_i32, %c0_i32_0 : i32, i32
  }
  func.func @transform_7(%arg0: i32) -> (i32, i32) {
    %c0_i32 = arith.constant 0 : i32
    %c0_i32_0 = arith.constant 0 : i32
    return %arg0, %c0_i32 : i32, i32
  }
}

</mosaic_0001>

<bundles_post_ra>
// kernel: tpu_custom_call.1
= control target key start
LH: loop header
LB: loop body
LE: loop exit
PB: predicated region body
PF: predicated region fallthrough
CT: control target
= control target key end

     0   :  { %s1353_s26 = smov 0   ;;  %s1620_s0 = inlined_call_operand.vmem [shape: f32[256,16], index: 0, kind: input, shape index: {}]   ;;  %s1621_s1 = inlined_call_operand.vmem [shape: f32[16,256], index: 1, kind: input, shape index: {}]   ;;  %s1622_s2 = inlined_call_operand.vmem [shape: f32[1,256], index: 2, kind: input, shape index: {}]   ;;  %s1623_s3 = inlined_call_operand.vmem [shape: bf16[256,128], index: 3, kind: input, shape index: {}]   ;;  %s1624_s4 = inlined_call_operand.vmem [shape: f32[1,128], index: 4, kind: input, shape index: {}]   ;;  %s1625_s5 = inlined_call_operand.vmem [shape: f32[1,128], index: 5, kind: input, shape index: {}]   ;;  %s1626_s6 = inlined_call_operand.<no memory space> [shape: f32[1,1], index: 6, kind: input, shape index: {}]   ;;  %s1627_s7 = inlined_call_operand.vmem [shape: f32[256,1], index: 7, kind: output, shape index: {}]  }
   0x1   :  { %v12_v0 = vstv %s1626_s6 }
   0x2   :  { %13 = vst [vmem:[#allocation2] sm:$0x1] %v12_v0 }
   0x3 LB: > { %s1070_s27 = sadd.s32 4294967295, %s1307_s26   ;;  %p1074_p0 = scmp.ge.s32.totalorder %s1307_s26, 1  ;;  %s1307_s26 = sphi %s1353_s26, %s19_s26  }
   0x4   : > { %p240_p1 = scmp.lt.s32.totalorder %s1307_s26, 3 }
   0x6   : > { %p241_p2 = pnand %p1074_p0, %p240_p1 }
   0x7   : > { %s1075_s10 = sshll.u32 (!%p241_p2), %s1070_s27, 4 }
   0x8   : > { %244 = sbr.rel (%p241_p2) target bundleno = 661 (0x295), region = 48  ;;  %p273_p3 = scmp.lt.s32.totalorder (!%p241_p2), %s1075_s10, 31 }
   0xd   : > { %v304_v1 = vld [vmem:[%s1621_s1 + $0x18] sm:$0xff]  ;;  %v303_v2 = vld [vmem:[%s1621_s1 + $0x10] sm:$0xff]  ;;  %v302_v3 = vld [vmem:[%s1621_s1 + $0x8] sm:$0xff]  ;;  %v1309_v5 = vmov 0.0   ;;  %s1629_s10 = smov (!%p273_p3, %s1075_s10), 31  ;;  %vm317_vm0 = vcmask 130048   ;;  %v307_v38 = vlaneseq }
   0xe   : > { %394 = vmatprep.subr.mxu0 %v304_v1  ;;  %v301_v4 = vld [vmem:[%s1621_s1] sm:$0xff]  ;;  %430 = vmatprep.mubr.f32.mxu0 %v1309_v5  ;;  %v1221_v6 = vld [vmem:[%s1623_s3 + $0x78] sm:$0xff]   ;;  %v1223_v8 = vld [vmem:[%s1623_s3 + $0x70] sm:$0xff]   ;;  %s1076_s19 = sshll.u32 %s1629_s10, 3  ;;  %vm997_vm1 = vcmask 7168  }
   0xf   : > { %395 = vmatpush1.msra.mxu0 %v303_v2  ;;  %v1222_v7 = vld [vmem:[%s1623_s3 + $0x38] sm:$0xff]   ;;  %1196 = vmatprep.subr.bf16.mxu1 %v1221_v6  ;;  %s1391_s22 = scalar_lea.vmem %s1620_s0, %s1076_s19  ;;  %v1224_v10 = vld [vmem:[%s1623_s3 + $0x30] sm:$0xff]   ;;  %v1225_v12 = vld [vmem:[%s1623_s3 + $0x68] sm:$0xff]   ;;  %v308_v39 = vshrl.u32 %v307_v38, 7  ;;  %s1575_s14 = scalar_lea.vmem %s1627_s7, %s1076_s19 }
  0x10   : > { %396 = vmatprep.subr.mxu0 %v302_v3  ;;  %1204 = vmatpush3.bf16.msra.mxu1 %v1222_v7  ;;  %v285_v9 = vld [vmem:[%s1391_s22] sm:$0xff]  ;;  %v286_v11 = vld [vmem:[%s1391_s22 + $0x8] sm:$0xff]  ;;  %v287_v13 = vld [vmem:[%s1391_s22 + $0x10] sm:$0xff] }
  0x11   : > { %397 = vmatpush1.msra.mxu0 %v301_v4  ;;  %1197 = vmatprep.subr.bf16.mxu1 %v1223_v8  ;;  %v1226_v14 = vld [vmem:[%s1623_s3 + $0x28] sm:$0xff]   ;;  %v1227_v15 = vld [vmem:[%s1623_s3 + $0x60] sm:$0xff]   ;;  %v288_v16 = vld [vmem:[%s1391_s22 + $0x18] sm:$0xff]  ;;  %v313_v40 = vsub.s32 1, %v308_v39  ;;  %v309_v41 = vsub.s32 0, %v308_v39 }
  0x12   : > { %1132 = vmatprep.subr.bf16.mxu0 %v1221_v6  ;;  %1079 = vmatmul.mubr.msk.f32.vlgmr.msra.gmra.mxu0 %vm317_vm0, %v285_v9  ;;  %v1228_v17 = vld [vmem:[%s1623_s3 + $0x20] sm:$0xff]   ;;  %v1229_v18 = vld [vmem:[%s1623_s3 + $0x58] sm:$0xff]   ;;  %v290_v21 = vld [vmem:[%s1391_s22 + $0x28] sm:$0xff] }
  0x13   : > { %436 = vmatprep.mubr.f32.mxu0 %v1309_v5  ;;  %1133 = vmatpush3.bf16.msra.mxu0 %v1222_v7  ;;  %v1230_v19 = vld [vmem:[%s1623_s3 + $0x18] sm:$0xff]   ;;  %v289_v20 = vld [vmem:[%s1391_s22 + $0x20] sm:$0xff]  ;;  %v291_v22 = vld [vmem:[%s1391_s22 + $0x30] sm:$0xff] }
  0x14   : > { %1134 = vmatprep.subr.bf16.mxu0 %v1223_v8  ;;  %1205 = vmatpush3.bf16.msra.mxu1 %v1224_v10  ;;  %v292_v23 = vld [vmem:[%s1391_s22 + $0x38] sm:$0xff]  ;;  %v293_v24 = vld [vmem:[%s1391_s22 + $0x40] sm:$0xff]  ;;  %v294_v25 = vld [vmem:[%s1391_s22 + $0x48] sm:$0xff] }
  0x15   : > { %1198 = vmatprep.subr.bf16.mxu1 %v1225_v12  ;;  %v295_v26 = vld [vmem:[%s1391_s22 + $0x50] sm:$0xff]  ;;  %v296_v27 = vld [vmem:[%s1391_s22 + $0x58] sm:$0xff]  ;;  %v297_v28 = vld [vmem:[%s1391_s22 + $0x60] sm:$0xff] }
  0x16   : > { %1080 = vmatmul.mubr.msk.f32.gmra.mxu0 %vm317_vm0, %v286_v11  ;;  %v298_v29 = vld [vmem:[%s1391_s22 + $0x68] sm:$0xff]  ;;  %v299_v30 = vld [vmem:[%s1391_s22 + $0x70] sm:$0xff]  ;;  %v300_v31 = vld [vmem:[%s1391_s22 + $0x78] sm:$0xff] }
  0x17   : > { %442 = vmatprep.mubr.f32.mxu0 %v1309_v5  ;;  %1135 = vmatpush3.bf16.msra.mxu0 %v1224_v10  ;;  %v1231_v32 = vld [vmem:[%s1623_s3 + $0x50] sm:$0xff]   ;;  %v1233_v34 = vld [vmem:[%s1623_s3 + $0x48] sm:$0xff]   ;;  %v1235_v36 = vld [vmem:[%s1623_s3 + $0x40] sm:$0xff]  }
  0x18   : > { %1136 = vmatprep.subr.bf16.mxu0 %v1225_v12  ;;  %1206 = vmatpush3.bf16.msra.mxu1 %v1226_v14  ;;  %v1232_v33 = vld [vmem:[%s1623_s3 + $0x10] sm:$0xff]   ;;  %v1234_v35 = vld [vmem:[%s1623_s3 + $0x8] sm:$0xff]   ;;  %v1236_v37 = vld [vmem:[%s1623_s3] sm:$0xff]  }
  0x19   : > { %1199 = vmatprep.subr.bf16.mxu1 %v1227_v15  ;;  %v305_v42 = vld [vmem:[%s1622_s2] sm:$0x3] }
  0x1a   : > { %1081 = vmatmul.mubr.msk.f32.gmra.mxu0 %vm317_vm0, %v287_v13  ;;  %v1482_v44 = vrot.slane %v305_v42, %v313_v40  ;;  %v1484_v45 = vrot.slane %v305_v42, %v309_v41 }
  0x1b   : > { %448 = vmatprep.mubr.f32.mxu0 %v1309_v5  ;;  %1137 = vmatpush3.bf16.msra.mxu0 %v1226_v14 }
  0x1c   : > { %1138 = vmatprep.subr.bf16.mxu0 %v1227_v15  ;;  %1207 = vmatpush3.bf16.msra.mxu1 %v1228_v17 }
  0x1d   : > { %1200 = vmatprep.subr.bf16.mxu1 %v1229_v18 }
  0x1e   : > { %1082 = vmatmul.mubr.msk.f32.gmra.mxu0 %vm317_vm0, %v288_v16 }
  0x1f   : > { %454 = vmatprep.mubr.f32.mxu0 %v1309_v5  ;;  %1139 = vmatpush3.bf16.msra.mxu0 %v1228_v17 }
  0x20   : > { %1140 = vmatprep.subr.bf16.mxu0 %v1229_v18  ;;  %1208 = vmatpush3.bf16.msra.mxu1 %v1230_v19 }
  0x21   : > { %1201 = vmatprep.subr.bf16.mxu1 %v1231_v32 }
  0x22   : > { %1083 = vmatmul.mubr.msk.f32.gmra.mxu0 %vm317_vm0, %v289_v20 }
  0x23   : > { %460 = vmatprep.mubr.f32.mxu0 %v1309_v5  ;;  %1141 = vmatpush3.bf16.msra.mxu0 %v1230_v19 }
  0x24   : > { %1142 = vmatprep.subr.bf16.mxu0 %v1231_v32  ;;  %1209 = vmatpush3.bf16.msra.mxu1 %v1232_v33 }
  0x25   : > { %1202 = vmatprep.subr.bf16.mxu1 %v1233_v34 }
  0x26   : > { %1084 = vmatmul.mubr.msk.f32.gmra.mxu0 %vm317_vm0, %v290_v21 }
  0x27   : > { %466 = vmatprep.mubr.f32.mxu0 %v1309_v5  ;;  %1143 = vmatpush3.bf16.msra.mxu0 %v1232_v33 }
  0x28   : > { %1144 = vmatprep.subr.bf16.mxu0 %v1233_v34  ;;  %1210 = vmatpush3.bf16.msra.mxu1 %v1234_v35 }
  0x29   : > { %1203 = vmatprep.subr.bf16.mxu1 %v1235_v36 }
  0x2a   : > { %1085 = vmatmul.mubr.msk.f32.gmra.mxu0 %vm317_vm0, %v291_v22 }
  0x2b   : > { %472 = vmatprep.mubr.f32.mxu0 %v1309_v5  ;;  %1145 = vmatpush3.bf16.msra.mxu0 %v1234_v35 }
  0x2c   : > { %1146 = vmatprep.subr.bf16.mxu0 %v1235_v36  ;;  %1211 = vmatpush3.bf16.msra.mxu1 %v1236_v37 }
  0x2e   : > { %1086 = vmatmul.mubr.msk.f32.gmra.mxu0 %vm317_vm0, %v292_v23 }
  0x2f   : > { %478 = vmatprep.mubr.f32.mxu0 %v1309_v5  ;;  %1147 = vmatpush3.bf16.msra.mxu0 %v1236_v37 }
  0x32   : > { %1087 = vmatmul.mubr.msk.f32.gmra.mxu0 %vm317_vm0, %v293_v24 }
  0x33   : > { %484 = vmatprep.mubr.f32.mxu0 %v1309_v5 }
  0x36   : > { %1088 = vmatmul.mubr.msk.f32.gmra.mxu0 %vm317_vm0, %v294_v25 }
  0x37   : > { %490 = vmatprep.mubr.f32.mxu0 %v1309_v5 }
  0x3a   : > { %1089 = vmatmul.mubr.msk.f32.gmra.mxu0 %vm317_vm0, %v295_v26 }
  0x3b   : > { %496 = vmatprep.mubr.f32.mxu0 %v1309_v5 }
  0x3e   : > { %1090 = vmatmul.mubr.msk.f32.gmra.mxu0 %vm317_vm0, %v296_v27 }
  0x3f   : > { %502 = vmatprep.mubr.f32.mxu0 %v1309_v5 }
  0x42   : > { %1091 = vmatmul.mubr.msk.f32.gmra.mxu0 %vm317_vm0, %v297_v28 }
  0x43   : > { %508 = vmatprep.mubr.f32.mxu0 %v1309_v5 }
  0x46   : > { %1092 = vmatmul.mubr.msk.f32.gmra.mxu0 %vm317_vm0, %v298_v29 }
  0x47   : > { %514 = vmatprep.mubr.f32.mxu0 %v1309_v5 }
  0x4a   : > { %1093 = vmatmul.mubr.msk.f32.gmra.mxu0 %vm317_vm0, %v299_v30 }
  0x4b   : > { %520 = vmatprep.mubr.f32.mxu0 %v1309_v5 }
  0x4e   : > { %1094 = vmatmul.mubr.msk.f32.gmra.mxu0 %vm317_vm0, %v300_v31 }
  0xd2   : > { %v432_v43 = vpop.f32.mrf.mxu0 }
  0xd3   : > { %v433_v50 = vadd.f32 %v432_v43, %v1484_v45 }
  0xd4   : > { %v434_v46 = vpop.f32.mrf.mxu0 }
  0xd5   : > { %v435_v48 = vadd.f32 %v434_v46, %v1482_v44  ;;  %v527_v57 = vmax.f32 %v433_v50, 0.0 }
  0xd6   : > { %v438_v47 = vpop.f32.mrf.mxu0 }
  0xd7   : > { %v439_v49 = vadd.f32 %v438_v47, %v1484_v45  ;;  %v528_v55 = vmax.f32 %v435_v48, 0.0 }
  0xd8   : > { %v440_v51 = vpop.f32.mrf.mxu0 }
  0xd9   : > { %v441_v52 = vadd.f32 %v440_v51, %v1482_v44  ;;  %v529_v53 = vmax.f32 %v439_v49, 0.0 }
  0xda   : > { %v444_v54 = vpop.f32.mrf.mxu0 }
  0xdb   : > { %v530_v56 = vmax.f32 %v441_v52, 0.0  ;;  %v559_v60 = vpack.c.bf16 %v529_v53, %v527_v57  ;;  %v445_v0 = vadd.f32 %v444_v54, %v1484_v45 }
  0xdc   : > { %v446_v58 = vpop.f32.mrf.mxu0 }
  0xdd   : > { %v560_v59 = vpack.c.bf16 %v530_v56, %v528_v55  ;;  %v447_v62 = vadd.f32 %v446_v58, %v1482_v44  ;;  %v531_v7 = vmax.f32 %v445_v0, 0.0 }
  0xde   : > { %v450_v61 = vpop.f32.mrf.mxu0 }
  0xdf   : > { %v451_v63 = vadd.f32 %v450_v61, %v1484_v45  ;;  %742 = vmatprep.mubr.bf16.mxu0 %v560_v59  ;;  %v532_v5 = vmax.f32 %v447_v62, 0.0 }
  0xe0   : > { %v452_v1 = vpop.f32.mrf.mxu0  ;;  %743 = vmatmul.mubr.bf16.vlgmr.msra.gmra.mxu0 %v559_v60 }
  0xe1   : > { %v453_v2 = vadd.f32 %v452_v1, %v1482_v44  ;;  %v533_v3 = vmax.f32 %v451_v63, 0.0 }
  0xe2   : > { %v456_v4 = vpop.f32.mrf.mxu0 }
  0xe3   : > { %v534_v6 = vmax.f32 %v453_v2, 0.0  ;;  %v561_v10 = vpack.c.bf16 %v533_v3, %v531_v7  ;;  %v457_v14 = vadd.f32 %v456_v4, %v1484_v45 }
  0xe4   : > { %v458_v8 = vpop.f32.mrf.mxu0 }
  0xe5   : > { %v562_v9 = vpack.c.bf16 %v534_v6, %v532_v5  ;;  %v459_v12 = vadd.f32 %v458_v8, %v1482_v44  ;;  %v535_v21 = vmax.f32 %v457_v14, 0.0 }
  0xe6   : > { %v462_v11 = vpop.f32.mrf.mxu0 }
  0xe7   : > { %v463_v13 = vadd.f32 %v462_v11, %v1484_v45  ;;  %750 = vmatprep.mubr.bf16.mxu1 %v562_v9  ;;  %v536_v19 = vmax.f32 %v459_v12, 0.0 }
  0xe8   : > { %v464_v15 = vpop.f32.mrf.mxu0  ;;  %751 = vmatmul.mubr.bf16.vlgmr.msra.gmra.mxu1 %v561_v10 }
  0xe9   : > { %v465_v16 = vadd.f32 %v464_v15, %v1482_v44  ;;  %v537_v17 = vmax.f32 %v463_v13, 0.0 }
  0xea   : > { %v468_v18 = vpop.f32.mrf.mxu0 }
  0xeb   : > { %v538_v20 = vmax.f32 %v465_v16, 0.0  ;;  %v563_v24 = vpack.c.bf16 %v537_v17, %v535_v21  ;;  %v469_v28 = vadd.f32 %v468_v18, %v1484_v45 }
  0xec   : > { %v470_v22 = vpop.f32.mrf.mxu0 }
  0xed   : > { %v564_v23 = vpack.c.bf16 %v538_v20, %v536_v19  ;;  %v471_v26 = vadd.f32 %v470_v22, %v1482_v44  ;;  %v539_v35 = vmax.f32 %v469_v28, 0.0 }
  0xee   : > { %v474_v25 = vpop.f32.mrf.mxu0 }
  0xef   : > { %v475_v27 = vadd.f32 %v474_v25, %v1484_v45  ;;  %758 = vmatprep.mubr.bf16.mxu1 %v564_v23  ;;  %v540_v33 = vmax.f32 %v471_v26, 0.0 }
  0xf0   : > { %v476_v29 = vpop.f32.mrf.mxu0  ;;  %759 = vmatmul.mubr.bf16.gmra.mxu1 %v563_v24 }
  0xf1   : > { %v477_v30 = vadd.f32 %v476_v29, %v1482_v44  ;;  %v541_v31 = vmax.f32 %v475_v27, 0.0 }
  0xf2   : > { %v480_v32 = vpop.f32.mrf.mxu0 }
  0xf3   : > { %v542_v34 = vmax.f32 %v477_v30, 0.0  ;;  %v565_v38 = vpack.c.bf16 %v541_v31, %v539_v35  ;;  %v481_v42 = vadd.f32 %v480_v32, %v1484_v45 }
  0xf4   : > { %v482_v36 = vpop.f32.mrf.mxu0 }
  0xf5   : > { %v566_v37 = vpack.c.bf16 %v542_v34, %v540_v33  ;;  %v483_v40 = vadd.f32 %v482_v36, %v1482_v44  ;;  %v543_v51 = vmax.f32 %v481_v42, 0.0  ;;  %v1521_v33 = vld [vmem:[%s1624_s4] ss:$0 sm:$0xff] }
  0xf6   : > { %v486_v39 = vpop.f32.mrf.mxu0  ;;  %v1527_v36 = vld [vmem:[%s1625_s5] ss:$0 sm:$0xff] }
  0xf7   : > { %v487_v41 = vadd.f32 %v486_v39, %v1484_v45  ;;  %766 = vmatprep.mubr.bf16.mxu1 %v566_v37  ;;  %v544_v49 = vmax.f32 %v483_v40, 0.0 }
  0xf8   : > { %v488_v43 = vpop.f32.mrf.mxu0  ;;  %767 = vmatmul.mubr.bf16.gmra.mxu1 %v565_v38 }
  0xf9   : > { %v489_v46 = vadd.f32 %v488_v43, %v1482_v44  ;;  %v545_v47 = vmax.f32 %v487_v41, 0.0 }
  0xfa   : > { %v492_v48 = vpop.f32.mrf.mxu0 }
  0xfb   : > { %v546_v50 = vmax.f32 %v489_v46, 0.0  ;;  %v567_v54 = vpack.c.bf16 %v545_v47, %v543_v51  ;;  %v493_v58 = vadd.f32 %v492_v48, %v1484_v45 }
  0xfc   : > { %v494_v52 = vpop.f32.mrf.mxu0 }
  0xfd   : > { %v568_v53 = vpack.c.bf16 %v546_v50, %v544_v49  ;;  %v495_v56 = vadd.f32 %v494_v52, %v1482_v44  ;;  %v547_v1 = vmax.f32 %v493_v58, 0.0 }
  0xfe   : > { %v498_v55 = vpop.f32.mrf.mxu0 }
  0xff   : > { %v499_v57 = vadd.f32 %v498_v55, %v1484_v45  ;;  %774 = vmatprep.mubr.bf16.mxu1 %v568_v53  ;;  %v548_v63 = vmax.f32 %v495_v56, 0.0 }
 0x100   : > { %v500_v59 = vpop.f32.mrf.mxu0  ;;  %775 = vmatmul.mubr.bf16.gmra.mxu1 %v567_v54 }
 0x101   : > { %v501_v60 = vadd.f32 %v500_v59, %v1482_v44  ;;  %v549_v61 = vmax.f32 %v499_v57, 0.0 }
 0x102   : > { %v504_v62 = vpop.f32.mrf.mxu0 }
 0x103   : > { %v550_v0 = vmax.f32 %v501_v60, 0.0  ;;  %v569_v4 = vpack.c.bf16 %v549_v61, %v547_v1  ;;  %v505_v8 = vadd.f32 %v504_v62, %v1484_v45 }
 0x104   : > { %v506_v2 = vpop.f32.mrf.mxu0 }
 0x105   : > { %v570_v3 = vpack.c.bf16 %v550_v0, %v548_v63  ;;  %v507_v6 = vadd.f32 %v506_v2, %v1482_v44  ;;  %v551_v15 = vmax.f32 %v505_v8, 0.0 }
 0x106   : > { %v510_v5 = vpop.f32.mrf.mxu0 }
 0x107   : > { %v511_v7 = vadd.f32 %v510_v5, %v1484_v45  ;;  %782 = vmatprep.mubr.bf16.mxu1 %v570_v3  ;;  %v552_v13 = vmax.f32 %v507_v6, 0.0 }
 0x108   : > { %v512_v9 = vpop.f32.mrf.mxu0  ;;  %783 = vmatmul.mubr.bf16.gmra.mxu1 %v569_v4 }
 0x109   : > { %v513_v10 = vadd.f32 %v512_v9, %v1482_v44  ;;  %v553_v11 = vmax.f32 %v511_v7, 0.0 }
 0x10a   : > { %v516_v12 = vpop.f32.mrf.mxu0 }
 0x10b   : > { %v554_v14 = vmax.f32 %v513_v10, 0.0  ;;  %v571_v18 = vpack.c.bf16 %v553_v11, %v551_v15  ;;  %v517_v22 = vadd.f32 %v516_v12, %v1484_v45 }
 0x10c   : > { %v518_v16 = vpop.f32.mrf.mxu0 }
 0x10d   : > { %v572_v17 = vpack.c.bf16 %v554_v14, %v552_v13  ;;  %v519_v20 = vadd.f32 %v518_v16, %v1482_v44  ;;  %v555_v28 = vmax.f32 %v517_v22, 0.0 }
 0x10e   : > { %v522_v19 = vpop.f32.mrf.mxu0 }
 0x10f   : > { %v523_v21 = vadd.f32 %v522_v19, %v1484_v45  ;;  %790 = vmatprep.mubr.bf16.mxu1 %v572_v17  ;;  %v556_v26 = vmax.f32 %v519_v20, 0.0 }
 0x110   : > { %v524_v23 = vpop.f32.mrf.mxu0  ;;  %791 = vmatmul.mubr.bf16.gmra.mxu1 %v571_v18 }
 0x111   : > { %v525_v24 = vadd.f32 %v524_v23, %v1482_v44  ;;  %v557_v25 = vmax.f32 %v523_v21, 0.0 }
 0x113   : > { %v558_v27 = vmax.f32 %v525_v24, 0.0  ;;  %v573_v30 = vpack.c.bf16 %v557_v25, %v555_v28 }
 0x115   : > { %v574_v29 = vpack.c.bf16 %v558_v27, %v556_v26 }
 0x117   : > { %798 = vmatprep.mubr.bf16.mxu1 %v574_v29 }
 0x118   : > { %799 = vmatmul.mubr.bf16.gmra.mxu1 %v573_v30 }
 0x1a0   : > { %v1148_v31 = vpop.f32.mrf.mxu0 }
 0x1a2   : > { %v1149_v32 = vpop.f32.mrf.mxu0 }
 0x1a3   : > { %v1150_v45 = vadd.f32 %v1149_v32, %v1148_v31 }
 0x1a4   : > { %v1151_v34 = vpop.f32.mrf.mxu0 }
 0x1a5   : > { %v745_v35 = vadd.f32 %v1150_v45, %v1521_v33 }
 0x1a6   : > { %v1152_v44 = vpop.f32.mrf.mxu0 }
 0x1a7   : > { %v1153_v37 = vadd.f32 %v1152_v44, %v1151_v34  ;;  %v807_v38 = vmax.f32 %v745_v35, 0.0 }
 0x1a8   : > { %v1154_v39 = vpop.f32.mrf.mxu1 }
 0x1a9   : > { %v748_v40 = vadd.f32 %v1153_v37, %v1521_v33  ;;  %v830_v41 = vmul.f32 %v1527_v36, %v807_v38 }
 0x1aa   : > { %v1155_v42 = vpop.f32.mrf.mxu1 }
 0x1ab   : > { %v808_v43 = vmax.f32 %v748_v40, 0.0  ;;  %v1156_v46 = vadd.f32 %v1155_v42, %v1154_v39  ;;  %846 = vadd.xlane.f32.xlu0 %v830_v41 }
 0x1ac   : > { %v1157_v47 = vpop.f32.mrf.mxu1 }
 0x1ad   : > { %v831_v48 = vmul.f32 %v1527_v36, %v808_v43  ;;  %v753_v49 = vadd.f32 %v1156_v46, %v1521_v33 }
 0x1ae   : > { %v1158_v50 = vpop.f32.mrf.mxu1 }
 0x1af   : > { %v1159_v51 = vadd.f32 %v1158_v50, %v1157_v47  ;;  %848 = vadd.xlane.f32.xlu0 %v831_v48  ;;  %v809_v52 = vmax.f32 %v753_v49, 0.0 }
 0x1b0   : > { %v1160_v53 = vpop.f32.mrf.mxu1 }
 0x1b1   : > { %v756_v54 = vadd.f32 %v1159_v51, %v1521_v33  ;;  %v832_v55 = vmul.f32 %v1527_v36, %v809_v52 }
 0x1b2   : > { %v1161_v56 = vpop.f32.mrf.mxu1 }
 0x1b3   : > { %v810_v57 = vmax.f32 %v756_v54, 0.0  ;;  %v1162_v58 = vadd.f32 %v1161_v56, %v1160_v53  ;;  %850 = vadd.xlane.f32.xlu1 %v832_v55 }
 0x1b4   : > { %v1163_v59 = vpop.f32.mrf.mxu1 }
 0x1b5   : > { %v761_v60 = vadd.f32 %v1162_v58, %v1521_v33  ;;  %v833_v61 = vmul.f32 %v1527_v36, %v810_v57 }
 0x1b6   : > { %v1164_v62 = vpop.f32.mrf.mxu1 }
 0x1b7   : > { %v811_v63 = vmax.f32 %v761_v60, 0.0  ;;  %v1165_v0 = vadd.f32 %v1164_v62, %v1163_v59  ;;  %852 = vadd.xlane.f32.xlu1 %v833_v61 }
 0x1b8   : > { %v1166_v1 = vpop.f32.mrf.mxu1 }
 0x1b9   : > { %v764_v2 = vadd.f32 %v1165_v0, %v1521_v33  ;;  %v834_v3 = vmul.f32 %v1527_v36, %v811_v63 }
 0x1ba   : > { %v1167_v4 = vpop.f32.mrf.mxu1 }
 0x1bb   : > { %v812_v5 = vmax.f32 %v764_v2, 0.0  ;;  %v1168_v6 = vadd.f32 %v1167_v4, %v1166_v1  ;;  %854 = vadd.xlane.f32.xlu0 %v834_v3  ;;  %v1560_v3 = vld [vmem:[#allocation2] ss:$0 sm:$0xff] }
 0x1bc   : > { %v1169_v7 = vpop.f32.mrf.mxu1 }
 0x1bd   : > { %v769_v8 = vadd.f32 %v1168_v6, %v1521_v33  ;;  %v835_v9 = vmul.f32 %v1527_v36, %v812_v5 }
 0x1be   : > { %v1170_v10 = vpop.f32.mrf.mxu1 }
 0x1bf   : > { %v813_v11 = vmax.f32 %v769_v8, 0.0  ;;  %v1171_v12 = vadd.f32 %v1170_v10, %v1169_v7  ;;  %856 = vadd.xlane.f32.xlu1 %v835_v9 }
 0x1c0   : > { %v1172_v13 = vpop.f32.mrf.mxu1 }
 0x1c1   : > { %v772_v14 = vadd.f32 %v1171_v12, %v1521_v33  ;;  %v836_v15 = vmul.f32 %v1527_v36, %v813_v11 }
 0x1c2   : > { %v1173_v16 = vpop.f32.mrf.mxu1 }
 0x1c3   : > { %v814_v17 = vmax.f32 %v772_v14, 0.0  ;;  %v1174_v18 = vadd.f32 %v1173_v16, %v1172_v13  ;;  %858 = vadd.xlane.f32.xlu0 %v836_v15 }
 0x1c4   : > { %v1175_v19 = vpop.f32.mrf.mxu1 }
 0x1c5   : > { %v777_v20 = vadd.f32 %v1174_v18, %v1521_v33  ;;  %v837_v21 = vmul.f32 %v1527_v36, %v814_v17 }
 0x1c6   : > { %v1176_v22 = vpop.f32.mrf.mxu1 }
 0x1c7   : > { %v815_v23 = vmax.f32 %v777_v20, 0.0  ;;  %v1177_v24 = vadd.f32 %v1176_v22, %v1175_v19  ;;  %860 = vadd.xlane.f32.xlu1 %v837_v21 }
 0x1c8   : > { %v1178_v25 = vpop.f32.mrf.mxu1 }
 0x1c9   : > { %v780_v26 = vadd.f32 %v1177_v24, %v1521_v33  ;;  %v838_v27 = vmul.f32 %v1527_v36, %v815_v23 }
 0x1ca   : > { %v1179_v28 = vpop.f32.mrf.mxu1 }
 0x1cb   : > { %v816_v29 = vmax.f32 %v780_v26, 0.0  ;;  %v1180_v30 = vadd.f32 %v1179_v28, %v1178_v25  ;;  %862 = vadd.xlane.f32.xlu0 %v838_v27 }
 0x1cc   : > { %v1181_v31 = vpop.f32.mrf.mxu1 }
 0x1cd   : > { %v785_v32 = vadd.f32 %v1180_v30, %v1521_v33  ;;  %v839_v45 = vmul.f32 %v1527_v36, %v816_v29 }
 0x1ce   : > { %v1182_v34 = vpop.f32.mrf.mxu1 }
 0x1cf   : > { %v817_v35 = vmax.f32 %v785_v32, 0.0  ;;  %v1183_v44 = vadd.f32 %v1182_v34, %v1181_v31  ;;  %864 = vadd.xlane.f32.xlu1 %v839_v45 }
 0x1d0   : > { %v1184_v37 = vpop.f32.mrf.mxu1 }
 0x1d1   : > { %v788_v38 = vadd.f32 %v1183_v44, %v1521_v33  ;;  %v840_v39 = vmul.f32 %v1527_v36, %v817_v35 }
 0x1d2   : > { %v1185_v40 = vpop.f32.mrf.mxu1 }
 0x1d3   : > { %v818_v41 = vmax.f32 %v788_v38, 0.0  ;;  %v1186_v42 = vadd.f32 %v1185_v40, %v1184_v37  ;;  %866 = vadd.xlane.f32.xlu0 %v840_v39 }
 0x1d4   : > { %v1187_v43 = vpop.f32.mrf.mxu1 }
 0x1d5   : > { %v793_v46 = vadd.f32 %v1186_v42, %v1521_v33  ;;  %v841_v47 = vmul.f32 %v1527_v36, %v818_v41 }
 0x1d6   : > { %v1188_v48 = vpop.f32.mrf.mxu1 }
 0x1d7   : > { %v819_v49 = vmax.f32 %v793_v46, 0.0  ;;  %v1189_v50 = vadd.f32 %v1188_v48, %v1187_v43  ;;  %868 = vadd.xlane.f32.xlu1 %v841_v47 }
 0x1d8   : > { %v1190_v51 = vpop.f32.mrf.mxu1 }
 0x1d9   : > { %v796_v52 = vadd.f32 %v1189_v50, %v1521_v33  ;;  %v842_v53 = vmul.f32 %v1527_v36, %v819_v49 }
 0x1da   : > { %v1191_v54 = vpop.f32.mrf.mxu1 }
 0x1db   : > { %v820_v55 = vmax.f32 %v796_v52, 0.0  ;;  %v1192_v56 = vadd.f32 %v1191_v54, %v1190_v51  ;;  %870 = vadd.xlane.f32.xlu0 %v842_v53 }
 0x1dc   : > { %v1193_v57 = vpop.f32.mrf.mxu1 }
 0x1dd   : > { %v801_v58 = vadd.f32 %v1192_v56, %v1521_v33  ;;  %v843_v59 = vmul.f32 %v1527_v36, %v820_v55 }
 0x1de   : > { %v1194_v60 = vpop.f32.mrf.mxu1 }
 0x1df   : > { %v821_v61 = vmax.f32 %v801_v58, 0.0  ;;  %v1195_v62 = vadd.f32 %v1194_v60, %v1193_v57  ;;  %872 = vadd.xlane.f32.xlu1 %v843_v59 }
 0x1e1   : > { %v804_v63 = vadd.f32 %v1195_v62, %v1521_v33  ;;  %v844_v0 = vmul.f32 %v1527_v36, %v821_v61 }
 0x1e3   : > { %v822_v1 = vmax.f32 %v804_v63, 0.0  ;;  %874 = vadd.xlane.f32.xlu0 %v844_v0 }
 0x1e5   : > { %v845_v2 = vmul.f32 %v1527_v36, %v822_v1 }
 0x1e7   : > { %876 = vadd.xlane.f32.xlu1 %v845_v2 }
 0x234   : > { %v847_v4 = vpop.xlane.xlu0 %846 }
 0x235   : > { %v885_v5 = vadd.f32 %v1560_v3, %v847_v4 }
 0x237   : > { %v1114_v6 = vmul.f32 -1.442695, %v885_v5 }
 0x238   : > { %v849_v7 = vpop.xlane.xlu0 %848 }
 0x239   : > { %1237 = vpow2.f32 %v1114_v6  ;;  %v886_v8 = vadd.f32 %v1560_v3, %v849_v7 }
 0x23b   : > { %v1115_v9 = vmul.f32 -1.442695, %v886_v8 }
 0x23c   : > { %v851_v10 = vpop.xlane.xlu1 %850 }
 0x23d   : > { %1239 = vpow2.f32 %v1115_v9  ;;  %v887_v33 = vadd.f32 %v1560_v3, %v851_v10 }
 0x23f   : > { %v1116_v11 = vmul.f32 -1.442695, %v887_v33 }
 0x240   : > { %v853_v12 = vpop.xlane.xlu1 %852 }
 0x241   : > { %1241 = vpow2.f32 %v1116_v11  ;;  %v888_v36 = vadd.f32 %v1560_v3, %v853_v12 }
 0x243   : > { %v1117_v13 = vmul.f32 -1.442695, %v888_v36 }
 0x244   : > { %v855_v14 = vpop.xlane.xlu0 %854 }
 0x245   : > { %1243 = vpow2.f32 %v1117_v13  ;;  %v889_v15 = vadd.f32 %v1560_v3, %v855_v14 }
 0x246   : > { %v1238_v16 = vpop.eup %1237 }
 0x247   : > { %v949_v17 = vadd.f32 1.0, %v1238_v16  ;;  %v1118_v18 = vmul.f32 -1.442695, %v889_v15 }
 0x248   : > { %v857_v19 = vpop.xlane.xlu1 %856 }
 0x249   : > { %1245 = vrcp.f32 %v949_v17  ;;  %v890_v20 = vadd.f32 %v1560_v3, %v857_v19 }
 0x24a   : > { %v1240_v21 = vpop.eup %1239  ;;  %1247 = vpow2.f32 %v1118_v18 }
 0x24b   : > { %v950_v22 = vadd.f32 1.0, %v1240_v21  ;;  %v1119_v23 = vmul.f32 -1.442695, %v890_v20 }
 0x24c   : > { %v859_v24 = vpop.xlane.xlu0 %858 }
 0x24d   : > { %1249 = vrcp.f32 %v950_v22  ;;  %v891_v25 = vadd.f32 %v1560_v3, %v859_v24 }
 0x24e   : > { %v1242_v26 = vpop.eup %1241  ;;  %1251 = vpow2.f32 %v1119_v23 }
 0x24f   : > { %v951_v27 = vadd.f32 1.0, %v1242_v26  ;;  %v1120_v28 = vmul.f32 -1.442695, %v891_v25 }
 0x250   : > { %v861_v29 = vpop.xlane.xlu1 %860 }
 0x251   : > { %1253 = vrcp.f32 %v951_v27  ;;  %v892_v30 = vadd.f32 %v1560_v3, %v861_v29 }
 0x252   : > { %v1244_v31 = vpop.eup %1243  ;;  %1255 = vpow2.f32 %v1120_v28 }
 0x253   : > { %v952_v32 = vadd.f32 1.0, %v1244_v31  ;;  %v1121_v45 = vmul.f32 -1.442695, %v892_v30 }
 0x254   : > { %v863_v34 = vpop.xlane.xlu0 %862 }
 0x255   : > { %1257 = vrcp.f32 %v952_v32  ;;  %v893_v35 = vadd.f32 %v1560_v3, %v863_v34 }
 0x256   : > { %v1246_v44 = vpop.eup %1245  ;;  %1259 = vpow2.f32 %v1121_v45 }
 0x257   : > { %v1248_v37 = vpop.eup %1247  ;;  %998 = vst.msk [vmem:[%s1575_s14] sm:$0xff] %vm997_vm1, %v1246_v44  ;;  %v1122_v38 = vmul.f32 -1.442695, %v893_v35 }
 0x258   : > { %v953_v39 = vadd.f32 1.0, %v1248_v37  ;;  %v865_v40 = vpop.xlane.xlu1 %864 }
 0x259   : > { %1261 = vpow2.f32 %v1122_v38  ;;  %v894_v41 = vadd.f32 %v1560_v3, %v865_v40 }
 0x25a   : > { %v1250_v42 = vpop.eup %1249  ;;  %1263 = vrcp.f32 %v953_v39 }
 0x25b   : > { %v1252_v43 = vpop.eup %1251  ;;  %999 = vst.msk [vmem:[%s1575_s14 + $0x8] sm:$0xff] %vm997_vm1, %v1250_v42  ;;  %v1123_v46 = vmul.f32 -1.442695, %v894_v41 }
 0x25c   : > { %v954_v47 = vadd.f32 1.0, %v1252_v43  ;;  %v867_v48 = vpop.xlane.xlu0 %866 }
 0x25d   : > { %1265 = vpow2.f32 %v1123_v46  ;;  %v895_v49 = vadd.f32 %v1560_v3, %v867_v48 }
 0x25e   : > { %v1254_v50 = vpop.eup %1253  ;;  %1267 = vrcp.f32 %v954_v47 }
 0x25f   : > { %v1256_v51 = vpop.eup %1255  ;;  %1000 = vst.msk [vmem:[%s1575_s14 + $0x10] sm:$0xff] %vm997_vm1, %v1254_v50  ;;  %v1124_v52 = vmul.f32 -1.442695, %v895_v49 }
 0x260   : > { %v955_v53 = vadd.f32 1.0, %v1256_v51  ;;  %v869_v54 = vpop.xlane.xlu1 %868 }
 0x261   : > { %1269 = vpow2.f32 %v1124_v52  ;;  %v896_v55 = vadd.f32 %v1560_v3, %v869_v54 }
 0x262   : > { %v1258_v56 = vpop.eup %1257  ;;  %1271 = vrcp.f32 %v955_v53 }
 0x263   : > { %v1260_v57 = vpop.eup %1259  ;;  %1001 = vst.msk [vmem:[%s1575_s14 + $0x18] sm:$0xff] %vm997_vm1, %v1258_v56  ;;  %v1125_v58 = vmul.f32 -1.442695, %v896_v55 }
 0x264   : > { %v956_v59 = vadd.f32 1.0, %v1260_v57  ;;  %v871_v60 = vpop.xlane.xlu0 %870 }
 0x265   : > { %1273 = vpow2.f32 %v1125_v58  ;;  %v897_v61 = vadd.f32 %v1560_v3, %v871_v60 }
 0x266   : > { %v1262_v62 = vpop.eup %1261  ;;  %1275 = vrcp.f32 %v956_v59 }
 0x267   : > { %v1264_v63 = vpop.eup %1263  ;;  %v957_v0 = vadd.f32 1.0, %v1262_v62  ;;  %v1126_v1 = vmul.f32 -1.442695, %v897_v61 }
 0x268   : > { %1002 = vst.msk [vmem:[%s1575_s14 + $0x20] sm:$0xff] %vm997_vm1, %v1264_v63  ;;  %v873_v2 = vpop.xlane.xlu1 %872 }
 0x269   : > { %1277 = vrcp.f32 %v957_v0  ;;  %v898_v4 = vadd.f32 %v1560_v3, %v873_v2 }
 0x26a   : > { %v1266_v5 = vpop.eup %1265  ;;  %1279 = vpow2.f32 %v1126_v1 }
 0x26b   : > { %v1268_v6 = vpop.eup %1267  ;;  %v958_v7 = vadd.f32 1.0, %v1266_v5  ;;  %v1127_v8 = vmul.f32 -1.442695, %v898_v4 }
 0x26c   : > { %1003 = vst.msk [vmem:[%s1575_s14 + $0x28] sm:$0xff] %vm997_vm1, %v1268_v6  ;;  %v875_v9 = vpop.xlane.xlu0 %874 }
 0x26d   : > { %1281 = vrcp.f32 %v958_v7  ;;  %v899_v10 = vadd.f32 %v1560_v3, %v875_v9 }
 0x26e   : > { %v1270_v33 = vpop.eup %1269  ;;  %1283 = vpow2.f32 %v1127_v8 }
 0x26f   : > { %v1272_v11 = vpop.eup %1271  ;;  %v959_v12 = vadd.f32 1.0, %v1270_v33  ;;  %v1128_v36 = vmul.f32 -1.442695, %v899_v10 }
 0x270   : > { %1004 = vst.msk [vmem:[%s1575_s14 + $0x30] sm:$0xff] %vm997_vm1, %v1272_v11  ;;  %v877_v13 = vpop.xlane.xlu1 %876 }
 0x271   : > { %1285 = vrcp.f32 %v959_v12  ;;  %v900_v14 = vadd.f32 %v1560_v3, %v877_v13 }
 0x272   : > { %v1274_v15 = vpop.eup %1273  ;;  %1287 = vpow2.f32 %v1128_v36 }
 0x273   : > { %v1276_v16 = vpop.eup %1275  ;;  %v960_v17 = vadd.f32 1.0, %v1274_v15  ;;  %v1129_v18 = vmul.f32 -1.442695, %v900_v14 }
 0x274   : > { %1005 = vst.msk [vmem:[%s1575_s14 + $0x38] sm:$0xff] %vm997_vm1, %v1276_v16 }
 0x275   : > { %1289 = vrcp.f32 %v960_v17 }
 0x276   : > { %v1278_v19 = vpop.eup %1277  ;;  %1291 = vpow2.f32 %v1129_v18 }
 0x277   : > { %v1280_v20 = vpop.eup %1279  ;;  %1006 = vst.msk [vmem:[%s1575_s14 + $0x40] sm:$0xff] %vm997_vm1, %v1278_v19 }
 0x278   : > { %v961_v21 = vadd.f32 1.0, %v1280_v20 }
 0x27a   : > { %v1282_v22 = vpop.eup %1281  ;;  %1293 = vrcp.f32 %v961_v21 }
 0x27b   : > { %v1284_v3 = vpop.eup %1283  ;;  %1007 = vst.msk [vmem:[%s1575_s14 + $0x48] sm:$0xff] %vm997_vm1, %v1282_v22 }
 0x27c   : > { %v962_v23 = vadd.f32 1.0, %v1284_v3 }
 0x27e   : > { %v1286_v24 = vpop.eup %1285  ;;  %1295 = vrcp.f32 %v962_v23 }
 0x27f   : > { %v1288_v25 = vpop.eup %1287  ;;  %1008 = vst.msk [vmem:[%s1575_s14 + $0x50] sm:$0xff] %vm997_vm1, %v1286_v24 }
 0x280   : > { %v963_v26 = vadd.f32 1.0, %v1288_v25 }
 0x282   : > { %v1290_v27 = vpop.eup %1289  ;;  %1297 = vrcp.f32 %v963_v26 }
 0x283   : > { %v1292_v28 = vpop.eup %1291  ;;  %1009 = vst.msk [vmem:[%s1575_s14 + $0x58] sm:$0xff] %vm997_vm1, %v1290_v27 }
 0x284   : > { %v964_v29 = vadd.f32 1.0, %v1292_v28 }
 0x286   : > { %1299 = vrcp.f32 %v964_v29 }
 0x287   : > { %v1294_v30 = vpop.eup %1293 }
 0x288   : > { %1010 = vst.msk [vmem:[%s1575_s14 + $0x60] sm:$0xff] %vm997_vm1, %v1294_v30 }
 0x28b   : > { %v1296_v31 = vpop.eup %1295 }
 0x28c   : > { %1011 = vst.msk [vmem:[%s1575_s14 + $0x68] sm:$0xff] %vm997_vm1, %v1296_v31 }
 0x28f   : > { %v1298_v32 = vpop.eup %1297 }
 0x290   : > { %1012 = vst.msk [vmem:[%s1575_s14 + $0x70] sm:$0xff] %vm997_vm1, %v1298_v32 }
 0x293   : > { %v1300_v45 = vpop.eup %1299 }
 0x294   : > { %1013 = vst.msk [vmem:[%s1575_s14 + $0x78] sm:$0xff] %vm997_vm1, %v1300_v45 }
 0x295 PF: > { %s19_s26 = sadd.s32 1, %s1307_s26  }
 0x296   : > { %p16_p4 = scmp.ge.s32.totalorder %s19_s26, 4  }
 0x298   :  { %18 = sbr.rel (!%p16_p4) target bundleno = 3 (0x3), region = 78 }

</bundles_post_ra>
